<compile_context>
chip_gen: v7x
topology: tpu7x:2x2x1
jax: 0.10.0
libtpu: 0.0.40
codegen_flags: <defaults>
</compile_context>

<pallas_src>
import math

import jax
import jax.numpy as jnp
from jax.experimental import pallas as pl
from jax.experimental.pallas import tpu as pltpu

_MiB = 1024 * 1024


def _round_up(x, m):
    return ((x + m - 1) // m) * m


def _chip_info():
    """Returns (vmem_capacity_bytes, num_tensorcores, mxu_width) with safe fallbacks."""
    kind = ""
    try:
        kind = jax.devices()[0].device_kind.lower()
    except Exception:
        pass
    is_v7 = ("v7" in kind) or ("7x" in kind)
    vmem = None
    try:
        vmem = int(pltpu.get_tpu_info().vmem_capacity_bytes)
    except Exception:
        vmem = None
    if not vmem or vmem <= 0:
        vmem = 64 * _MiB if is_v7 else 128 * _MiB
    num_tc = 2 if is_v7 else 1
    mxu = 256 if (is_v7 or "v6" in kind) else 128
    return vmem, num_tc, mxu


# --------------------------------------------------------------------------------------
# Path A: whole MLP fused in one grid step per batch tile (all weights resident in VMEM)
# --------------------------------------------------------------------------------------
def _make_fused_kernel(num_layer, batch, tile_b):
    def kernel(x_ref, w_ref, b_ref, out_ref):
        t = pl.program_id(0)
        h0 = x_ref[...].astype(jnp.float32)

        def layer(l, h):
            # w_ref is (L, Dp, Dp) in (in_dim, out_dim) layout -> plain dot, no transpose.
            y = jnp.dot(h.astype(w_ref.dtype), w_ref[l],
                        preferred_element_type=jnp.float32)
            y = y + b_ref[l].astype(jnp.float32)          # (1, Dp) broadcast over rows
            return jnp.maximum(y, 0.0)

        h = jax.lax.fori_loop(0, num_layer, layer, h0, unroll=num_layer <= 8)

        # Padded dim lanes are exactly zero by construction; padded batch rows (which pick
        # up the bias) are masked out of the loss sum.
        valid = jnp.minimum(batch - t * tile_b, tile_b)
        rows = jax.lax.broadcasted_iota(jnp.int32, h.shape, 0)
        s = jnp.sum(jnp.where(rows < valid, h, 0.0))
        out_ref[...] = jnp.full(out_ref.shape, s, dtype=jnp.float32)

    return kernel


# --------------------------------------------------------------------------------------
# Path B: per-layer (and per-out_dim-tile) weight streaming with ping-pong activations
# --------------------------------------------------------------------------------------
def _make_layered_kernel(num_layer, batch, tile_b, tn, act_dtype):
    def kernel(x_ref, w_ref, b_ref, out_ref, act_ref):
        t = pl.program_id(0)
        l = pl.program_id(1)
        nt = pl.program_id(2)

        col = pl.multiple_of(nt * tn, tn)
        last = l == num_layer - 1

        # New batch tile: load the input into activation slot 0 (compute dtype).
        @pl.when((l == 0) & (nt == 0))
        def _():
            act_ref[0] = x_ref[...].astype(act_dtype)

        # Start accumulating the loss partial sum for this batch tile.
        @pl.when(last & (nt == 0))
        def _():
            out_ref[...] = jnp.zeros_like(out_ref)

        def step(src, dst):
            a_in = act_ref[src]                                        # (tile_b, Dp)
            y = jnp.dot(a_in.astype(w_ref.dtype), w_ref[...],          # (Dp, tn) weight tile
                        preferred_element_type=jnp.float32)
            y = y + b_ref[...].astype(jnp.float32)                     # (1, tn) broadcast
            a = jnp.maximum(y, 0.0)                                    # f32 (tile_b, tn)
            act_ref[dst, :, pl.ds(col, tn)] = a.astype(act_dtype)

            @pl.when(last)
            def _():
                valid = jnp.minimum(batch - t * tile_b, tile_b)
                rows = jax.lax.broadcasted_iota(jnp.int32, a.shape, 0)
                s = jnp.sum(jnp.where(rows < valid, a, 0.0))
                out_ref[...] = out_ref[...] + s

        # Static ping-pong between the two activation slots (no dynamic slot indexing).
        @pl.when(l % 2 == 0)
        def _():
            step(0, 1)

        @pl.when(l % 2 == 1)
        def _():
            step(1, 0)

    return kernel


def mlp_forward(x, weights, biases, *, compute_dtype=jnp.bfloat16,
                force_layered=False, force_out_tiles=None):
    """x: (B, D) f32; weights: (L, D, D) f32 (PyTorch (out,in) layout); biases: (L, D) f32.

    Returns scalar f32 == mean( relu(...relu(x @ W0^T + b0)... @ W_{L-1}^T + b_{L-1}) ).
    """
    num_layer, dim, _ = weights.shape
    batch = x.shape[0]

    vmem_cap, num_tc, mxu = _chip_info()
    # Never ask for more scoped VMEM than physically exists (v7x: 64 MiB per TensorCore).
    vmem_ceiling = int(min(vmem_cap - 8 * _MiB, 112 * _MiB))

    # ---- wrapper-side layout plumbing (free): pad, transpose, cast ----
    dp = _round_up(dim, 128)
    if mxu >= 256 and dp > 128:
        dp = _round_up(dim, 256)       # full 256-deep MXU passes on v6e / v7x
    bp8 = _round_up(batch, 8)

    w_item = jnp.dtype(compute_dtype).itemsize
    a_item = w_item                    # x / activations streamed in compute dtype
    weight_bytes = num_layer * dp * dp * w_item
    bias_bytes = num_layer * dp * 4

    def pick_tile_b(rows_cap, prefer):
        tb = min(bp8, prefer)
        tb = min(tb, max(8, (rows_cap // 8) * 8))
        if num_tc >= 2 and bp8 >= 16:
            # v7x: keep >= num_tc batch tiles so the "parallel" axis feeds both TensorCores.
            tb = min(tb, _round_up((bp8 + num_tc - 1) // num_tc, 8))
        return max(8, tb)

    # ---- path selection (generation-aware budgets) ----
    fused_budget = vmem_cap // 4                      # ~32 MiB v5e/v6e, ~16 MiB v7x
    fused_per_row = dp * (2 * a_item + 4 * 4)         # x double-buffer + f32 working set
    fused_act_room = vmem_ceiling - 2 * (weight_bytes + bias_bytes) - 64 * 1024

    use_fused = ((not force_layered)
                 and weight_bytes <= fused_budget
                 and fused_act_room >= 8 * fused_per_row)
    if use_fused:
        tile_b = pick_tile_b(fused_act_room // fused_per_row, prefer=512)
        n_bt = _round_up(bp8, tile_b) // tile_b
        # Big resident weights + few batch tiles: the whole weight DMA would be exposed in a
        # single fused step; the streaming path double-buffers W_{l+1} behind layer l's matmul.
        if weight_bytes > fused_budget // 2 and n_bt <= 2:
            use_fused = False

    if use_fused:
        tn = dp
        n_nt = 1
        est = (2 * (weight_bytes + bias_bytes) + tile_b * fused_per_row + 2 * 128 * 4)
    else:
        # Tile the weight out_dim so the double-buffered weight block fits even for large Dp.
        budget_w = vmem_ceiling // 2
        lane_blocks = dp // 128
        n_nt = lane_blocks
        for d in range(1, lane_blocks + 1):
            if lane_blocks % d:
                continue
            if 2 * dp * (dp // d) * w_item <= budget_w:
                n_nt = d
                break
        if force_out_tiles is not None and lane_blocks % int(force_out_tiles) == 0:
            n_nt = max(n_nt, int(force_out_tiles))
        tn = dp // n_nt
        w_block_bytes = 2 * dp * tn * w_item + 2 * tn * 4
        # Per batch-tile row: x double-buffer + (2, tile_b, Dp) ping-pong activation scratch.
        per_row = dp * (2 * a_item + 2 * a_item)
        rows_cap = max(8, (vmem_ceiling - w_block_bytes - 64 * 1024) // per_row)
        tile_b = pick_tile_b(rows_cap, prefer=1024)   # big tiles cut weight re-streaming
        est = w_block_bytes + tile_b * per_row + 2 * 128 * 4

    vmem_limit = int(min(vmem_ceiling, max(32 * _MiB, int(est * 1.3))))

    bp = _round_up(bp8, tile_b)
    n_bt = bp // tile_b

    # Padded arrays.  Zero-padded dim lanes stay exactly zero through Linear+ReLU.
    x_p = (jnp.zeros((bp, dp), compute_dtype)
           .at[:batch, :dim].set(x.astype(compute_dtype)))
    w_t = jnp.transpose(weights, (0, 2, 1))                               # (L, in_dim, out_dim)
    w_p = (jnp.zeros((num_layer, dp, dp), jnp.float32)
           .at[:, :dim, :dim].set(w_t.astype(jnp.float32))).astype(compute_dtype)
    b_p = (jnp.zeros((num_layer, 1, dp), jnp.float32)
           .at[:, 0, :dim].set(biases.astype(jnp.float32)))

    out_shape = jax.ShapeDtypeStruct((n_bt, 1, 128), jnp.float32)         # per-tile partial sums

    if use_fused:
        partial = pl.pallas_call(
            _make_fused_kernel(num_layer, batch, tile_b),
            out_shape=out_shape,
            grid_spec=pltpu.PrefetchScalarGridSpec(
                num_scalar_prefetch=0,
                grid=(n_bt,),
                in_specs=[
                    pl.BlockSpec((tile_b, dp), lambda t: (t, 0)),             # x tile
                    pl.BlockSpec((num_layer, dp, dp), lambda t: (0, 0, 0)),   # all weights
                    pl.BlockSpec((num_layer, 1, dp), lambda t: (0, 0, 0)),    # all biases
                ],
                out_specs=pl.BlockSpec((1, 1, 128), lambda t: (t, 0, 0)),
            ),
            compiler_params=pltpu.CompilerParams(
                dimension_semantics=("parallel",),
                vmem_limit_bytes=vmem_limit,
            ),
        )(x_p, w_p, b_p)
    else:
        partial = pl.pallas_call(
            _make_layered_kernel(num_layer, batch, tile_b, tn, compute_dtype),
            out_shape=out_shape,
            grid_spec=pltpu.PrefetchScalarGridSpec(
                num_scalar_prefetch=0,
                grid=(n_bt, num_layer, n_nt),
                in_specs=[
                    pl.BlockSpec((tile_b, dp), lambda t, l, n: (t, 0)),               # x tile
                    pl.BlockSpec((pl.Squeezed(), dp, tn), lambda t, l, n: (l, 0, n)),  # W_l N-tile
                    pl.BlockSpec((pl.Squeezed(), 1, tn), lambda t, l, n: (l, 0, n)),   # b_l N-tile
                ],
                out_specs=pl.BlockSpec((1, 1, 128), lambda t, l, n: (t, 0, 0)),
                scratch_shapes=[pltpu.VMEM((2, tile_b, dp), compute_dtype)],
            ),
            compiler_params=pltpu.CompilerParams(
                dimension_semantics=("parallel", "arbitrary", "arbitrary"),
                vmem_limit_bytes=vmem_limit,
            ),
        )(x_p, w_p, b_p)

    # SimpleLoss: mean over the *valid* (batch, dim) region only.
    return jnp.sum(partial[:, 0, 0]) / (batch * dim)


def _reference(x, weights, biases, compute_dtype):
    """Pure-JAX reference mirroring the kernel's mixed-precision dot."""
    h = x.astype(jnp.float32)
    for l in range(weights.shape[0]):
        w = weights[l].T.astype(compute_dtype)
        y = jnp.dot(h.astype(compute_dtype), w, preferred_element_type=jnp.float32)
        h = jnp.maximum(y + biases[l].astype(jnp.float32), 0.0)
    return jnp.mean(h)


if __name__ == "__main__":
    key = jax.random.PRNGKey(0)

    # ---- test 1: small MLP, exercises fused and streaming paths ----
    num_layer, dim, batch = 3, 32, 8
    k1, k2, k3, k4, k5, k6 = jax.random.split(key, 6)
    bound = 1.0 / math.sqrt(dim)
    x = jax.random.normal(k1, (batch, dim), dtype=jnp.float32)
    weights = jax.random.uniform(k2, (num_layer, dim, dim), minval=-bound, maxval=bound,
                                 dtype=jnp.float32)
    biases = jax.random.uniform(k3, (num_layer, dim), minval=-bound, maxval=bound,
                                dtype=jnp.float32)

    out_fused = mlp_forward(x, weights, biases)
    out_layered = mlp_forward(x, weights, biases, force_layered=True)
    jax.block_until_ready((out_fused, out_layered))

    ref_bf16 = _reference(x, weights, biases, jnp.bfloat16)   # same numerics as kernel
    ref_f32 = _reference(x, weights, biases, jnp.float32)     # full-precision sanity check
    assert jnp.allclose(out_fused, ref_bf16, atol=1e-3, rtol=1e-3), (out_fused, ref_bf16)
    assert jnp.allclose(out_layered, ref_bf16, atol=1e-3, rtol=1e-3), (out_layered, ref_bf16)
    assert jnp.allclose(out_fused, ref_f32, atol=5e-2, rtol=5e-2), (out_fused, ref_f32)

    # ---- test 2: exercise the N-tiled (out_dim-tiled) streaming path + ping-pong scratch ----
    num_layer2, dim2, batch2 = 2, 256, 16
    bound2 = 1.0 / math.sqrt(dim2)
    x2 = jax.random.normal(k4, (batch2, dim2), dtype=jnp.float32)
    weights2 = jax.random.uniform(k5, (num_layer2, dim2, dim2), minval=-bound2, maxval=bound2,
                                  dtype=jnp.float32)
    biases2 = jax.random.uniform(k6, (num_layer2, dim2), minval=-bound2, maxval=bound2,
                                 dtype=jnp.float32)
    out_nt = mlp_forward(x2, weights2, biases2, force_layered=True, force_out_tiles=2)
    jax.block_until_ready(out_nt)
    ref2 = _reference(x2, weights2, biases2, jnp.bfloat16)
    assert jnp.allclose(out_nt, ref2, atol=1e-3, rtol=1e-3), (out_nt, ref2)

    print("KERNEL_OK")
</pallas_src>

<mosaic_0001>
module attributes {stable_mosaic.version = 11 : i64} {
  func.func @kernel(%arg0: i32, %arg1: memref<8x128xbf16, #tpu.memory_space<vmem>>, %arg2: memref<3x128x128xbf16, #tpu.memory_space<vmem>>, %arg3: memref<3x1x128xf32, #tpu.memory_space<vmem>>, %arg4: memref<1x1x128xf32, #tpu.memory_space<vmem>>) attributes {dimension_semantics = [#tpu.dimension_semantics<parallel>], iteration_bounds = array<i64: 1>, scalar_prefetch = 0 : i64, scratch_operands = 0 : i64, tpu.core_type = #tpu.core_type<tc>, window_params = [{transform_indices = @transform_0, window_bounds = array<i64: 8, 128>}, {pipeline_mode = #tpu.pipeline_mode<synchronous>, transform_indices = @transform_1, window_bounds = array<i64: 3, 128, 128>}, {pipeline_mode = #tpu.pipeline_mode<synchronous>, transform_indices = @transform_2, window_bounds = array<i64: 3, 1, 128>}, {transform_indices = @transform_3, window_bounds = array<i64: 1, 1, 128>}]} {
    %c0 = arith.constant 0 : index
    %c0_0 = arith.constant 0 : index
    %0 = vector.load %arg1[%c0, %c0_0] : memref<8x128xbf16, #tpu.memory_space<vmem>>, vector<8x128xbf16>
    %1 = arith.extf %0 : vector<8x128xbf16> to vector<8x128xf32>
    %c0_i32 = arith.constant 0 : i32
    %2 = arith.truncf %1 : vector<8x128xf32> to vector<8x128xbf16>
    %3 = arith.index_cast %c0_i32 : i32 to index
    %c0_1 = arith.constant 0 : index
    %c0_2 = arith.constant 0 : index
    %4 = vector.load %arg2[%3, %c0_1, %c0_2] : memref<3x128x128xbf16, #tpu.memory_space<vmem>>, vector<1x128x128xbf16>
    %5 = vector.shape_cast %4 : vector<1x128x128xbf16> to vector<128x128xbf16>
    %cst = arith.constant dense<0.000000e+00> : vector<8x128xf32>
    %6 = tpu.matmul %2, %5, %cst {dimension_numbers = #tpu.dot_dimension_numbers<[1], [0], [0], [1], [0, 0, 1, 1], [], []>} : vector<8x128xbf16>, vector<128x128xbf16>, vector<8x128xf32> -> vector<8x128xf32>
    %7 = arith.index_cast %c0_i32 : i32 to index
    %c0_3 = arith.constant 0 : index
    %c0_4 = arith.constant 0 : index
    %8 = vector.load %arg3[%7, %c0_3, %c0_4] : memref<3x1x128xf32, #tpu.memory_space<vmem>>, vector<1x1x128xf32>
    %9 = vector.shape_cast %8 : vector<1x1x128xf32> to vector<1x128xf32>
    %10 = vector.broadcast %9 : vector<1x128xf32> to vector<8x128xf32>
    %11 = arith.addf %6, %10 : vector<8x128xf32>
    %cst_5 = arith.constant 0.000000e+00 : f32
    %12 = vector.broadcast %cst_5 : f32 to vector<8x128xf32>
    %13 = arith.maximumf %11, %12 : vector<8x128xf32>
    %c1_i32 = arith.constant 1 : i32
    %14 = arith.truncf %13 : vector<8x128xf32> to vector<8x128xbf16>
    %15 = arith.index_cast %c1_i32 : i32 to index
    %c0_6 = arith.constant 0 : index
    %c0_7 = arith.constant 0 : index
    %16 = vector.load %arg2[%15, %c0_6, %c0_7] : memref<3x128x128xbf16, #tpu.memory_space<vmem>>, vector<1x128x128xbf16>
    %17 = vector.shape_cast %16 : vector<1x128x128xbf16> to vector<128x128xbf16>
    %cst_8 = arith.constant dense<0.000000e+00> : vector<8x128xf32>
    %18 = tpu.matmul %14, %17, %cst_8 {dimension_numbers = #tpu.dot_dimension_numbers<[1], [0], [0], [1], [0, 0, 1, 1], [], []>} : vector<8x128xbf16>, vector<128x128xbf16>, vector<8x128xf32> -> vector<8x128xf32>
    %19 = arith.index_cast %c1_i32 : i32 to index
    %c0_9 = arith.constant 0 : index
    %c0_10 = arith.constant 0 : index
    %20 = vector.load %arg3[%19, %c0_9, %c0_10] : memref<3x1x128xf32, #tpu.memory_space<vmem>>, vector<1x1x128xf32>
    %21 = vector.shape_cast %20 : vector<1x1x128xf32> to vector<1x128xf32>
    %22 = vector.broadcast %21 : vector<1x128xf32> to vector<8x128xf32>
    %23 = arith.addf %18, %22 : vector<8x128xf32>
    %cst_11 = arith.constant 0.000000e+00 : f32
    %24 = vector.broadcast %cst_11 : f32 to vector<8x128xf32>
    %25 = arith.maximumf %23, %24 : vector<8x128xf32>
    %c2_i32 = arith.constant 2 : i32
    %26 = arith.truncf %25 : vector<8x128xf32> to vector<8x128xbf16>
    %27 = arith.index_cast %c2_i32 : i32 to index
    %c0_12 = arith.constant 0 : index
    %c0_13 = arith.constant 0 : index
    %28 = vector.load %arg2[%27, %c0_12, %c0_13] : memref<3x128x128xbf16, #tpu.memory_space<vmem>>, vector<1x128x128xbf16>
    %29 = vector.shape_cast %28 : vector<1x128x128xbf16> to vector<128x128xbf16>
    %cst_14 = arith.constant dense<0.000000e+00> : vector<8x128xf32>
    %30 = tpu.matmul %26, %29, %cst_14 {dimension_numbers = #tpu.dot_dimension_numbers<[1], [0], [0], [1], [0, 0, 1, 1], [], []>} : vector<8x128xbf16>, vector<128x128xbf16>, vector<8x128xf32> -> vector<8x128xf32>
    %31 = arith.index_cast %c2_i32 : i32 to index
    %c0_15 = arith.constant 0 : index
    %c0_16 = arith.constant 0 : index
    %32 = vector.load %arg3[%31, %c0_15, %c0_16] : memref<3x1x128xf32, #tpu.memory_space<vmem>>, vector<1x1x128xf32>
    %33 = vector.shape_cast %32 : vector<1x1x128xf32> to vector<1x128xf32>
    %34 = vector.broadcast %33 : vector<1x128xf32> to vector<8x128xf32>
    %35 = arith.addf %30, %34 : vector<8x128xf32>
    %cst_17 = arith.constant 0.000000e+00 : f32
    %36 = vector.broadcast %cst_17 : f32 to vector<8x128xf32>
    %37 = arith.maximumf %35, %36 : vector<8x128xf32>
    %c3_i32 = arith.constant 3 : i32
    %c8_i32 = arith.constant 8 : i32
    %38 = arith.muli %arg0, %c8_i32 : i32
    %c8_i32_18 = arith.constant 8 : i32
    %39 = arith.subi %c8_i32_18, %38 : i32
    %c8_i32_19 = arith.constant 8 : i32
    %40 = arith.minsi %39, %c8_i32_19 : i32
    %41 = tpu.iota {dimensions = array<i32: 0>} : vector<8x128xi32>
    %42 = vector.broadcast %40 : i32 to vector<8x128xi32>
    %43 = arith.cmpi slt, %41, %42 : vector<8x128xi32>
    %cst_20 = arith.constant 0.000000e+00 : f32
    %44 = vector.broadcast %cst_20 : f32 to vector<8x128xf32>
    %45 = arith.select %43, %37, %44 : vector<8x128xi1>, vector<8x128xf32>
    %46 = vector.shape_cast %45 : vector<8x128xf32> to vector<1x8x128xf32>
    %cst_21 = arith.constant dense<0.000000e+00> : vector<1xf32>
    %47 = vector.multi_reduction <add>, %46, %cst_21 [1, 2] : vector<1x8x128xf32> to vector<1xf32>
    %48 = vector.shape_cast %47 : vector<1xf32> to vector<1x1x1xf32>
    %49 = vector.extract %48[0, 0, 0] : f32 from vector<1x1x1xf32>
    %50 = vector.broadcast %49 : f32 to vector<1x1x128xf32>
    %c0_22 = arith.constant 0 : index
    %c0_23 = arith.constant 0 : index
    %c0_24 = arith.constant 0 : index
    %51 = vector.load %arg4[%c0_22, %c0_23, %c0_24] : memref<1x1x128xf32, #tpu.memory_space<vmem>>, vector<1x1x128xf32>
    tpu.vector_store %arg4[%c0_22, %c0_23, %c0_24], %50 {strides = array<i32>} : memref<1x1x128xf32, #tpu.memory_space<vmem>>, vector<1x1x128xf32>,
    return
  }
  func.func @transform_0(%arg0: i32) -> (i32, i32) {
    %c0_i32 = arith.constant 0 : i32
    %c0_i32_0 = arith.constant 0 : i32
    return %arg0, %c0_i32 : i32, i32
  }
  func.func @transform_1(%arg0: i32) -> (i32, i32, i32) {
    %c0_i32 = arith.constant 0 : i32
    %c0_i32_0 = arith.constant 0 : i32
    %c0_i32_1 = arith.constant 0 : i32
    %c0_i32_2 = arith.constant 0 : i32
    return %c0_i32, %c0_i32_0, %c0_i32_1 : i32, i32, i32
  }
  func.func @transform_2(%arg0: i32) -> (i32, i32, i32) {
    %c0_i32 = arith.constant 0 : i32
    %c0_i32_0 = arith.constant 0 : i32
    %c0_i32_1 = arith.constant 0 : i32
    %c0_i32_2 = arith.constant 0 : i32
    return %c0_i32, %c0_i32_0, %c0_i32_1 : i32, i32, i32
  }
  func.func @transform_3(%arg0: i32) -> (i32, i32, i32) {
    %c0_i32 = arith.constant 0 : i32
    %c0_i32_0 = arith.constant 0 : i32
    %c0_i32_1 = arith.constant 0 : i32
    return %arg0, %c0_i32, %c0_i32_0 : i32, i32, i32
  }
}

</mosaic_0001>

<bundles_post_ra>
// kernel: tpu_custom_call.1
= control target key start
LH: loop header
LB: loop body
LE: loop exit
PB: predicated region body
PF: predicated region fallthrough
CT: control target
= control target key end

     0   :  { %8 = vsyncpa [#allocation3], 0  ;;  %s751_s0 = inlined_call_operand.hbm [shape: bf16[8,128], index: 0, kind: input, shape index: {}]   ;;  %s752_s1 = inlined_call_operand.hbm [shape: bf16[3,128,128], index: 1, kind: input, shape index: {}]   ;;  %s753_s2 = inlined_call_operand.vmem [shape: f32[3,1,128], index: 2, kind: input, shape index: {}]   ;;  %s754_s3 = inlined_call_operand.hbm [shape: f32[1,1,128], index: 3, kind: output, shape index: {}]  }
   0x1   :  { %9 = vsyncpa [#allocation6], 0 }
   0x2   :  { %10 = vsyncpa [#allocation4], 0  ;;  %s642_s12 = smov [#allocation2]   ;;  %s643_s14 = smov [#allocation5]  }
   0x3   :  { %s17_s13 = sshll.u32 %s642_s12, 4  ;;  %s26_s15 = sshll.u32 %s643_s14, 4  ;;  %s18_s13 = int_to_ptr.vmem [resolvable:$true] %s17_s13  ;;  %s669_s15 = int_to_ptr.vmem [resolvable:$true] %s26_s15 }
   0x4   :  { %s570_s18 = scalar_lea.hbm %s751_s0, 64 }
   0x5   :  { %p571_p0 = scmp.ne.s32.totalorder %s751_s0, %s570_s18  ;;  %p574_p1 = scmp.lt.u32.totalorder %s570_s18, %s751_s0 }
   0x7   :  { %p576_p2 = pnand %p574_p1, %p571_p0 }
   0x9   :  { %579 = shalt.err (!%p576_p2)
}
   0xa   :  { %s580_s23 = scalar_lea.vmem %s18_s13, 64  ;;  %p585_p4 = scmp.lt.s32.totalorder %s18_s13, %s18_s13 }
   0xb   :  { %p581_p3 = scmp.ne.s32.totalorder %s18_s13, %s580_s23  ;;  %p586_p5 = scmp.lt.s32.totalorder %s580_s23, %s580_s23 }
   0xd   :  { %p587_p6 = por %p586_p5, %p585_p4 }
   0xf   :  { %p588_p7 = pnand %p587_p6, %p581_p3 }
  0x11   :  { %591 = shalt.err (!%p588_p7)
}
  0x12   :  { %20 = dma.hbm_to_vmem [thread:$0]  %s751_s0, 64, %s18_s13, [#allocation3]  }
  0x13   :  { %s592_s28 = scalar_lea.hbm %s752_s1, 3072 }
  0x14   :  { %p593_p8 = scmp.ne.s32.totalorder %s752_s1, %s592_s28  ;;  %p596_p9 = scmp.lt.u32.totalorder %s592_s28, %s752_s1 }
  0x16   :  { %p598_p10 = pnand %p596_p9, %p593_p8 }
  0x18   :  { %601 = shalt.err (!%p598_p10)
}
  0x19   :  { %s602_s6 = scalar_lea.vmem %s669_s15, 3072  ;;  %p607_p12 = scmp.lt.s32.totalorder %s669_s15, %s669_s15 }
  0x1a   :  { %p603_p11 = scmp.ne.s32.totalorder %s669_s15, %s602_s6  ;;  %p608_p13 = scmp.lt.s32.totalorder %s602_s6, %s602_s6 }
  0x1c   :  { %p609_p0 = por %p608_p13, %p607_p12 }
  0x1e   :  { %p610_p1 = pnand %p609_p0, %p603_p11 }
  0x20   :  { %613 = shalt.err (!%p610_p1)
}
  0x21   :  { %s644_s0 = smov 64   ;;  %s645_s7 = smov 4  }
  0x22   :  { %32 = dma.hbm_to_vmem [thread:$0]  %s752_s1, 3072, %s669_s15, [#allocation6], %s644_s0, %s644_s0, %s645_s7  }
  0x23   :  { %636 = dma.done.wait [#allocation3], 64  }
  0x24   :  { %637 = vsyncadd [#allocation3], 4294967232 }
  0x25   :  { %638 = dma.done.wait [#allocation6], 3072  }
  0x26   :  { %639 = vsyncadd [#allocation6], 4294964224  ;;  %v646_v0 = vmov 0.0   ;;  %vm647_vm0 = vmmov 0   ;;  %v546_v1 = vld [vmem:[#allocation5] sm:$0xff]   ;;  %v547_v2 = vld [vmem:[#allocation5 + $0x8] sm:$0xff]  }
  0x27   :  { %477 = vmatprep.subr.bf16.mxu0 %v646_v0  ;;  %493 = vmatprep.mubr.msk.bf16.mxu0 %vm647_vm0, %v646_v0  ;;  %v548_v3 = vld [vmem:[#allocation5 + $0x10] sm:$0xff]   ;;  %v554_v4 = vld [vmem:[#allocation5 + $0x40] sm:$0xff]   ;;  %v549_v5 = vld [vmem:[#allocation5 + $0x18] sm:$0xff]   ;;  %s648_s15 = smov [#allocation7]  }
  0x28   :  { %497 = vmatprep.subr.bf16.mxu1 %v646_v0  ;;  %513 = vmatprep.mubr.msk.bf16.mxu1 %vm647_vm0, %v646_v0  ;;  %v555_v6 = vld [vmem:[#allocation5 + $0x48] sm:$0xff]   ;;  %v550_v7 = vld [vmem:[#allocation5 + $0x20] sm:$0xff]   ;;  %v556_v8 = vld [vmem:[#allocation5 + $0x50] sm:$0xff]   ;;  %s411_s16 = sshll.u32 %s648_s15, 4  ;;  %s412_s16 = int_to_ptr.vmem [resolvable:$true] %s411_s16 }
  0x29   :  { %478 = vmatpush3.bf16.msra.mxu0 %v546_v1  ;;  %498 = vmatpush3.bf16.msra.mxu1 %v554_v4  ;;  %v551_v9 = vld [vmem:[#allocation5 + $0x28] sm:$0xff]   ;;  %v557_v10 = vld [vmem:[#allocation5 + $0x58] sm:$0xff]   ;;  %v552_v11 = vld [vmem:[#allocation5 + $0x30] sm:$0xff]   ;;  %s618_s18 = scalar_lea.vmem %s412_s16, 32  ;;  %p619_p3 = scmp.lt.s32.totalorder %s412_s16, %s412_s16 }
  0x2a   :  { %479 = vmatprep.subr.bf16.mxu0 %v646_v0  ;;  %499 = vmatprep.subr.bf16.mxu1 %v646_v0  ;;  %v558_v12 = vld [vmem:[#allocation5 + $0x60] sm:$0xff]   ;;  %v553_v13 = vld [vmem:[#allocation5 + $0x38] sm:$0xff]   ;;  %v559_v14 = vld [vmem:[#allocation5 + $0x68] sm:$0xff]  }
  0x2b   :  { %v42_v15 = vld [vmem:[#allocation2] sm:$0xf]  ;;  %v560_v16 = vld [vmem:[#allocation5 + $0x70] sm:$0xff]   ;;  %v562_v18 = vld [vmem:[#allocation5 + $0x80] sm:$0xff]  }
  0x2c   :  { %v561_v17 = vld [vmem:[#allocation5 + $0x78] sm:$0xff]   ;;  %v563_v19 = vld [vmem:[#allocation5 + $0x88] sm:$0xff]   ;;  %v564_v20 = vld [vmem:[#allocation5 + $0x90] sm:$0xff]  }
  0x2d   :  { %480 = vmatpush3.bf16.msra.mxu0 %v547_v2  ;;  %500 = vmatpush3.bf16.msra.mxu1 %v555_v6  ;;  %v565_v21 = vld [vmem:[#allocation5 + $0x98] sm:$0xff]   ;;  %v566_v22 = vld [vmem:[#allocation5 + $0xa0] sm:$0xff]   ;;  %v567_v23 = vld [vmem:[#allocation5 + $0xa8] sm:$0xff]  }
  0x2e   :  { %481 = vmatprep.subr.bf16.mxu0 %v646_v0  ;;  %501 = vmatprep.subr.bf16.mxu1 %v646_v0  ;;  %v421_v24 = vld [vmem:[%s753_s2] ss:$0 sm:$0xff]  ;;  %v568_v32 = vld [vmem:[#allocation5 + $0xb0] sm:$0xff]   ;;  %v431_v34 = vld [vmem:[%s753_s2 + $0x1] ss:$0 sm:$0xff] }
  0x2f   :  { %v569_v33 = vld [vmem:[#allocation5 + $0xb8] sm:$0xff]  }
  0x30   :  { %v441_v42 = vld [vmem:[%s753_s2 + $0x2] ss:$0 sm:$0xff]  ;;  %s614_s2 = scalar_lea.vmem %s412_s16, 16 }
  0x31   :  { %482 = vmatpush3.bf16.msra.mxu0 %v548_v3  ;;  %502 = vmatpush3.bf16.msra.mxu1 %v556_v8  ;;  %p615_p2 = scmp.ne.s32.totalorder %s412_s16, %s614_s2  ;;  %p620_p4 = scmp.lt.s32.totalorder %s618_s18, %s614_s2 }
  0x32   :  { %483 = vmatprep.subr.bf16.mxu0 %v646_v0  ;;  %503 = vmatprep.subr.bf16.mxu1 %v646_v0 }
  0x33   :  { %p621_p5 = por %p620_p4, %p619_p3 }
  0x35   :  { %484 = vmatpush3.bf16.msra.mxu0 %v549_v5  ;;  %504 = vmatpush3.bf16.msra.mxu1 %v557_v10  ;;  %p622_p6 = pnand %p621_p5, %p615_p2 }
  0x36   :  { %485 = vmatprep.subr.bf16.mxu0 %v646_v0  ;;  %505 = vmatprep.subr.bf16.mxu1 %v646_v0 }
  0x39   :  { %486 = vmatpush3.bf16.msra.mxu0 %v550_v7  ;;  %506 = vmatpush3.bf16.msra.mxu1 %v558_v12 }
  0x3a   :  { %487 = vmatprep.subr.bf16.mxu0 %v646_v0  ;;  %507 = vmatprep.subr.bf16.mxu1 %v646_v0 }
  0x3d   :  { %488 = vmatpush3.bf16.msra.mxu0 %v551_v9  ;;  %508 = vmatpush3.bf16.msra.mxu1 %v559_v14 }
  0x3e   :  { %489 = vmatprep.subr.bf16.mxu0 %v646_v0  ;;  %509 = vmatprep.subr.bf16.mxu1 %v646_v0 }
  0x41   :  { %490 = vmatpush3.bf16.msra.mxu0 %v552_v11  ;;  %510 = vmatpush3.bf16.msra.mxu1 %v560_v16 }
  0x42   :  { %491 = vmatprep.subr.bf16.mxu0 %v646_v0  ;;  %511 = vmatprep.subr.bf16.mxu1 %v646_v0 }
  0x45   :  { %492 = vmatpush3.bf16.msra.mxu0 %v553_v13  ;;  %512 = vmatpush3.bf16.msra.mxu1 %v561_v17 }
  0x46   :  { %517 = vmatprep.subr.bf16.mxu0 %v646_v0 }
  0x48   :  { %494 = vmatmul.mubr.bf16.vlgmr.msra.gmra.mrb[0].mxu0 %v42_v15 }
  0x49   :  { %533 = vmatprep.mubr.msk.bf16.mxu0 %vm647_vm0, %v646_v0  ;;  %518 = vmatpush3.bf16.msra.mxu0 %v562_v18 }
  0x4a   :  { %519 = vmatprep.subr.bf16.mxu0 %v646_v0 }
  0x4d   :  { %520 = vmatpush3.bf16.msra.mxu0 %v563_v19 }
  0x4e   :  { %521 = vmatprep.subr.bf16.mxu0 %v646_v0 }
  0x51   :  { %522 = vmatpush3.bf16.msra.mxu0 %v564_v20 }
  0x52   :  { %523 = vmatprep.subr.bf16.mxu0 %v646_v0 }
  0x55   :  { %524 = vmatpush3.bf16.msra.mxu0 %v565_v21 }
  0x56   :  { %525 = vmatprep.subr.bf16.mxu0 %v646_v0 }
  0x59   :  { %526 = vmatpush3.bf16.msra.mxu0 %v566_v22 }
  0x5a   :  { %527 = vmatprep.subr.bf16.mxu0 %v646_v0 }
  0x5d   :  { %528 = vmatpush3.bf16.msra.mxu0 %v567_v23 }
  0x5e   :  { %529 = vmatprep.subr.bf16.mxu0 %v646_v0 }
  0x61   :  { %530 = vmatpush3.bf16.msra.mxu0 %v568_v32 }
  0x62   :  { %531 = vmatprep.subr.bf16.mxu0 %v646_v0 }
  0x65   :  { %532 = vmatpush3.bf16.msra.mxu0 %v569_v33 }
 0x11b   :  { %v148_v25 = vpop.f32.mrb[0].mxu0 }
 0x11c   :  { %v149_v26 = vadd.f32 %v421_v24, %v148_v25  ;;  %v495_v27 = vpop.f32.mrb[1].mxu0 }
 0x11d   :  { %v151_v28 = vpop.f32.mrb[2].mxu0 }
 0x11e   :  { %v154_v29 = vmax.f32 %v149_v26, 0.0  ;;  %v496_v30 = vpop.f32.mrb[3].mxu0 }
 0x120   :  { %v155_v31 = vpack.c.bf16 %v154_v29, %v154_v29 }
 0x122   :  { %514 = vmatmul.mubr.bf16.vlgmr.msra.gmra.mrb[0].mxu1 %v155_v31 }
 0x1f5   :  { %v263_v35 = vpop.f32.mrb[0].mxu1 }
 0x1f6   :  { %v264_v36 = vadd.f32 %v431_v34, %v263_v35  ;;  %v515_v37 = vpop.f32.mrb[1].mxu1 }
 0x1f7   :  { %v266_v38 = vpop.f32.mrb[2].mxu1 }
 0x1f8   :  { %v269_v39 = vmax.f32 %v264_v36, 0.0  ;;  %v516_v40 = vpop.f32.mrb[3].mxu1 }
 0x1fa   :  { %v270_v41 = vpack.c.bf16 %v269_v39, %v269_v39 }
 0x1fc   :  { %534 = vmatmul.mubr.bf16.vlgmr.msra.gmra.mrb[4].mxu0 %v270_v41 }
 0x2cf   :  { %v378_v43 = vpop.f32.mrb[4].mxu0 }
 0x2d0   :  { %v535_v44 = vpop.f32.mrb[5].mxu0  ;;  %v379_v45 = vadd.f32 %v441_v42, %v378_v43 }
 0x2d1   :  { %v381_v46 = vpop.f32.mrb[6].mxu0 }
 0x2d2   :  { %v536_v47 = vpop.f32.mrb[7].mxu0  ;;  %v384_v48 = vmax.f32 %v379_v45, 0.0 }
 0x2d4   :  { %394 = vadd.xlane.f32.xlu0 %v384_v48 }
 0x361   :  { %v395_v49 = vpop.xlane.xlu0 %394 }
 0x362   :  { %v396_v50 = vrot.slane %v395_v49, 4 }
 0x364   :  { %v397_v51 = vadd.f32 %v396_v50, %v395_v49 }
 0x366   :  { %v398_v52 = vrot.slane %v397_v51, 2 }
 0x368   :  { %v399_v53 = vadd.f32 %v398_v52, %v397_v51 }
 0x36a   :  { %v400_v54 = vrot.slane %v399_v53, 1 }
 0x36c   :  { %v401_v55 = vadd.f32 %v400_v54, %v399_v53 }
 0x36e   :  { %537 = vpush %v401_v55 }
 0x39f   :  { %s538_s17 = spop %537 }
 0x3a0   :  { %v403_v56 = vstv %s538_s17 }
 0x3a1   :  { %404 = vst [vmem:[#allocation7] sm:$0x1] %v403_v56 }
 0x3a2   :  { %625 = shalt.err (!%p622_p6)
}
 0x3a3   :  { %s626_s21 = scalar_lea.hbm %s754_s3, 16 }
 0x3a4   :  { %p627_p7 = scmp.ne.s32.totalorder %s754_s3, %s626_s21  ;;  %p630_p8 = scmp.lt.u32.totalorder %s626_s21, %s754_s3 }
 0x3a6   :  { %p632_p9 = pnand %p630_p8, %p627_p7 }
 0x3a8   :  { %635 = shalt.err (!%p632_p9)
}
 0x3a9   :  { %414 = dma.vmem_to_hbm [thread:$0]  %s412_s16, 16, %s754_s3, [#allocation4]  }
 0x3aa   :  { %640 = dma.done.wait [#allocation4], 16  }
 0x3ab   :  { %641 = vsyncadd [#allocation4], 4294967280 }
 0x3ac   :  { %418 = vsyncpa [#allocation3], 1 }
 0x3ad   :  { %419 = vsyncpa [#allocation6], 1 }
 0x3ae   :  { %420 = vsyncpa [#allocation4], 1 }

</bundles_post_ra>
